<compile_context>
chip_gen: v7x
topology: tpu7x:2x2x1
jax: 0.10.0
libtpu: 0.0.40
codegen_flags: <defaults>
</compile_context>

<pallas_src>
import functools

import jax
import jax.numpy as jnp
from jax.experimental import pallas as pl
from jax.experimental.pallas import tpu as pltpu


# ---------------------------------------------------------------------------
# Temperature scaling: out = logits / T   (ModelWithTemperature.temperature_scale)
# ---------------------------------------------------------------------------
def _temp_scale_kernel(logits_ref, temp_ref, out_ref):
    x = logits_ref[...].astype(jnp.float32)      # (TN, C)
    t = temp_ref[...]                            # (1, 1) f32, resident block
    out_ref[...] = (x / t).astype(out_ref.dtype)


def temperature_scale(logits, temperature, *, block_n=256):
    n, c = logits.shape
    bn = n if n <= block_n else max(8, (block_n // 8) * 8)
    grid = (pl.cdiv(n, bn),)
    temp = jnp.asarray(temperature, jnp.float32).reshape(1, 1)
    return pl.pallas_call(
        _temp_scale_kernel,
        out_shape=jax.ShapeDtypeStruct((n, c), logits.dtype),
        grid_spec=pltpu.PrefetchScalarGridSpec(
            num_scalar_prefetch=0,
            grid=grid,
            in_specs=[
                pl.BlockSpec((bn, c), lambda i: (i, 0)),
                pl.BlockSpec((1, 1), lambda i: (0, 0)),
            ],
            out_specs=pl.BlockSpec((bn, c), lambda i: (i, 0)),
        ),
        compiler_params=pltpu.CompilerParams(
            dimension_semantics=("parallel",)),
    )(logits, temp)


# ---------------------------------------------------------------------------
# ECE (Expected Calibration Error)  (_ECELoss.forward)
# ---------------------------------------------------------------------------
def _ece_kernel(logits_ref, labels_ref, out_ref,
                count_ref, conf_sum_ref, acc_sum_ref, *, n_total, n_bins):
    i = pl.program_id(0)

    @pl.when(i == 0)
    def _init():
        count_ref[...] = jnp.zeros_like(count_ref)
        conf_sum_ref[...] = jnp.zeros_like(conf_sum_ref)
        acc_sum_ref[...] = jnp.zeros_like(acc_sum_ref)

    logits = logits_ref[...].astype(jnp.float32)        # (TN, C)
    labels = labels_ref[...]                            # (TN, 1) int32
    tn, c = logits.shape

    # Mask rows past the real batch (last, possibly partial, tile).
    row = i * tn + jax.lax.broadcasted_iota(jnp.int32, (tn, 1), 0)
    valid = (row < n_total).astype(jnp.float32)         # (TN, 1)

    # Softmax max-prob without materializing probs:
    #   conf = exp(max - max) / sum(exp(x - max)) = 1 / sum(exp(x - max))
    m = jnp.max(logits, axis=1, keepdims=True)          # (TN, 1)
    s = jnp.sum(jnp.exp(logits - m), axis=1, keepdims=True)
    conf = pl.reciprocal(s, approx=False)               # (TN, 1)

    # argmax on raw logits (softmax is monotonic); first max index like torch.max.
    ids = jax.lax.broadcasted_iota(jnp.int32, (tn, c), 1)
    pred = jnp.min(jnp.where(logits == m, ids, c), axis=1, keepdims=True)
    correct = (pred == labels).astype(jnp.float32)      # (TN, 1)

    # Bin boundaries generated in-kernel: lower = b/n_bins, upper = (b+1)/n_bins.
    b = jax.lax.broadcasted_iota(jnp.int32, (1, n_bins), 1).astype(jnp.float32)
    lowers = b / jnp.float32(n_bins)
    uppers = (b + 1.0) / jnp.float32(n_bins)

    in_bin = jnp.logical_and(conf > lowers, conf <= uppers).astype(jnp.float32)
    in_bin = in_bin * valid                             # (TN, B)

    count_ref[...] += jnp.sum(in_bin, axis=0, keepdims=True)
    conf_sum_ref[...] += jnp.sum(in_bin * conf, axis=0, keepdims=True)
    acc_sum_ref[...] += jnp.sum(in_bin * correct, axis=0, keepdims=True)

    @pl.when(i == pl.num_programs(0) - 1)
    def _finalize():
        count = count_ref[...]
        denom = jnp.maximum(count, 1.0)
        prop = count / jnp.float32(n_total)
        gap = jnp.abs(conf_sum_ref[...] / denom - acc_sum_ref[...] / denom) * prop
        gap = jnp.where(count > 0.0, gap, 0.0)
        out_ref[0, 0] = jnp.sum(gap)


def ece_loss(logits, labels, n_bins=15, *, block_n=256):
    """Pallas ECE. logits: (N, C) float (f32/bf16), labels: (N,) int -> (1,) f32."""
    n, c = logits.shape
    bn = n if n <= block_n else max(8, (block_n // 8) * 8)
    grid = (pl.cdiv(n, bn),)
    labels2d = labels.astype(jnp.int32).reshape(n, 1)
    kernel = functools.partial(_ece_kernel, n_total=n, n_bins=n_bins)
    out = pl.pallas_call(
        kernel,
        out_shape=jax.ShapeDtypeStruct((1, 1), jnp.float32),
        grid_spec=pltpu.PrefetchScalarGridSpec(
            num_scalar_prefetch=0,
            grid=grid,
            in_specs=[
                pl.BlockSpec((bn, c), lambda i: (i, 0)),
                pl.BlockSpec((bn, 1), lambda i: (i, 0)),
            ],
            out_specs=pl.BlockSpec((1, 1), lambda i: (0, 0)),
            scratch_shapes=[
                pltpu.VMEM((1, n_bins), jnp.float32),   # count
                pltpu.VMEM((1, n_bins), jnp.float32),   # conf sum
                pltpu.VMEM((1, n_bins), jnp.float32),   # accuracy sum
            ],
        ),
        compiler_params=pltpu.CompilerParams(
            dimension_semantics=("arbitrary",)),
    )(logits, labels2d)
    return out.reshape(1)


# ---------------------------------------------------------------------------
# Pure-JAX references for correctness checks
# ---------------------------------------------------------------------------
def _ece_reference(logits, labels, n_bins=15):
    probs = jax.nn.softmax(logits.astype(jnp.float32), axis=1)
    conf = jnp.max(probs, axis=1)
    pred = jnp.argmax(probs, axis=1)
    acc = (pred == labels).astype(jnp.float32)
    ece = jnp.zeros((1,), jnp.float32)
    for i in range(n_bins):
        lo = i / n_bins
        hi = (i + 1) / n_bins
        in_bin = (conf > lo) & (conf <= hi)
        prop = jnp.mean(in_bin.astype(jnp.float32))
        cnt = jnp.sum(in_bin.astype(jnp.float32))
        acc_in = jnp.sum(jnp.where(in_bin, acc, 0.0)) / jnp.maximum(cnt, 1.0)
        conf_in = jnp.sum(jnp.where(in_bin, conf, 0.0)) / jnp.maximum(cnt, 1.0)
        ece = ece + jnp.where(cnt > 0, jnp.abs(conf_in - acc_in) * prop, 0.0)
    return ece


if __name__ == "__main__":
    key = jax.random.PRNGKey(0)
    k1, k2 = jax.random.split(key)
    N, C = 64, 16
    logits = jax.random.normal(k1, (N, C), dtype=jnp.float32) * 3.0
    labels = jax.random.randint(k2, (N,), 0, C, dtype=jnp.int32)
    temperature = 1.5

    # ModelWithTemperature forward: temperature-scaled logits (Pallas kernel).
    scaled = jax.block_until_ready(
        temperature_scale(logits, temperature, block_n=32))
    scaled_ref = logits / jnp.float32(temperature)
    assert scaled.shape == (N, C)
    assert jnp.allclose(scaled, scaled_ref, atol=1e-6), "temperature_scale mismatch"

    # _ECELoss on the temperature-scaled logits (gridded Pallas kernel).
    ece = jax.block_until_ready(ece_loss(scaled, labels, block_n=32))
    ref = jax.block_until_ready(_ece_reference(scaled_ref, labels))
    assert ece.shape == (1,)
    assert jnp.allclose(ece, ref, atol=1e-5), (ece, ref)

    print("KERNEL_OK")
</pallas_src>

<mosaic_0001>
module attributes {stable_mosaic.version = 11 : i64} {
  func.func @_temp_scale_kernel(%arg0: i32, %arg1: memref<32x16xf32, #tpu.memory_space<vmem>>, %arg2: memref<1x1xf32, #tpu.memory_space<vmem>>, %arg3: memref<32x16xf32, #tpu.memory_space<vmem>>) attributes {dimension_semantics = [#tpu.dimension_semantics<parallel>], iteration_bounds = array<i64: 2>, scalar_prefetch = 0 : i64, scratch_operands = 0 : i64, tpu.core_type = #tpu.core_type<tc>, window_params = [{transform_indices = @transform_0, window_bounds = array<i64: 32, 16>}, {pipeline_mode = #tpu.pipeline_mode<synchronous>, transform_indices = @transform_1, window_bounds = array<i64: 1, 1>}, {transform_indices = @transform_2, window_bounds = array<i64: 32, 16>}]} {
    %c0 = arith.constant 0 : index
    %c0_0 = arith.constant 0 : index
    %0 = vector.load %arg1[%c0, %c0_0] : memref<32x16xf32, #tpu.memory_space<vmem>>, vector<32x16xf32>
    %c0_1 = arith.constant 0 : index
    %c0_2 = arith.constant 0 : index
    %1 = vector.load %arg2[%c0_1, %c0_2] : memref<1x1xf32, #tpu.memory_space<vmem>>, vector<1x1xf32>
    %2 = vector.broadcast %1 : vector<1x1xf32> to vector<32x16xf32>
    %3 = arith.divf %0, %2 : vector<32x16xf32>
    %c0_3 = arith.constant 0 : index
    %c0_4 = arith.constant 0 : index
    %4 = vector.load %arg3[%c0_3, %c0_4] : memref<32x16xf32, #tpu.memory_space<vmem>>, vector<32x16xf32>
    tpu.vector_store %arg3[%c0_3, %c0_4], %3 {strides = array<i32>} : memref<32x16xf32, #tpu.memory_space<vmem>>, vector<32x16xf32>,
    return
  }
  func.func @transform_0(%arg0: i32) -> (i32, i32) {
    %c0_i32 = arith.constant 0 : i32
    %c0_i32_0 = arith.constant 0 : i32
    return %arg0, %c0_i32 : i32, i32
  }
  func.func @transform_1(%arg0: i32) -> (i32, i32) {
    %c0_i32 = arith.constant 0 : i32
    %c0_i32_0 = arith.constant 0 : i32
    %c0_i32_1 = arith.constant 0 : i32
    return %c0_i32, %c0_i32_0 : i32, i32
  }
  func.func @transform_2(%arg0: i32) -> (i32, i32) {
    %c0_i32 = arith.constant 0 : i32
    %c0_i32_0 = arith.constant 0 : i32
    return %arg0, %c0_i32 : i32, i32
  }
}

</mosaic_0001>

<bundles_post_ra>
// kernel: tpu_custom_call.1
= control target key start
LH: loop header
LB: loop body
LE: loop exit
PB: predicated region body
PF: predicated region fallthrough
CT: control target
= control target key end

     0   :  { %s280_s11 = smov 0   ;;  %s297_s0 = inlined_call_operand.vmem [shape: f32[64,16], index: 0, kind: input, shape index: {}]   ;;  %s298_s1 = inlined_call_operand.<no memory space> [shape: f32[1,1], index: 1, kind: input, shape index: {}]   ;;  %s299_s2 = inlined_call_operand.vmem [shape: f32[64,16], index: 2, kind: output, shape index: {}]  }
   0x1   :  { %v7_v0 = vstv %s298_s1 }
   0x2   :  { %8 = vst [vmem:[#allocation2] sm:$0x1] %v7_v0 }
   0x3 LB: > { %s229_s12 = sadd.s32 4294967295, %s259_s11   ;;  %p233_p0 = scmp.ge.s32.totalorder %s259_s11, 1  ;;  %s259_s11 = sphi %s280_s11, %s14_s11  }
   0x4   : > { %p115_p1 = scmp.lt.s32.totalorder %s259_s11, 3 }
   0x6   : > { %p116_p2 = pnand %p233_p0, %p115_p1 }
   0x7   : > { %v261_v2 = vmov (!%p116_p2), 0   ;;  %s234_s1 = sshll.u32 (!%p116_p2), %s229_s12, 2  ;;  %vm168_vm0 = vcmask (!%p116_p2), 130048  }
   0x8   : > { %119 = sbr.rel (%p116_p2) target bundleno = 153 (0x99), region = 28  ;;  %250 = vset.pattern.permute.xlu0 (!%p116_p2), %v261_v2  ;;  %p138_p3 = scmp.lt.s32.totalorder (!%p116_p2), %s234_s1, 7 }
   0x9   : > { %v238_v1 = vld [vmem:[#allocation2] ss:$0 sm:$0xff] (!%p116_p2) }
   0xa   : > { %160 = vperm.xlu0 (!%p116_p2), %250, %v238_v1  }
   0xf   : > { %s301_s1 = smov (!%p138_p3, %s234_s1), 7 }
  0x10   : > { %s235_s13 = sshll.u32 %s301_s1, 3 }
  0x11   : > { %s141_s16 = scalar_lea.vmem %s297_s0, %s235_s13  ;;  %s147_s19 = scalar_lea.vmem %s299_s2, %s235_s13 }
  0x12   : > { %v149_v4 = vld [vmem:[%s141_s16] sm:$0xff]  ;;  %v150_v5 = vld [vmem:[%s141_s16 + $0x8] sm:$0xff]  ;;  %v151_v7 = vld [vmem:[%s141_s16 + $0x10] sm:$0xff] }
  0x13   : > { %v152_v8 = vld [vmem:[%s141_s16 + $0x18] sm:$0xff] }
  0x89   : > { %v161_v3 = vpop.permute.xlu0 %160 }
  0x8a   : > { %251 = vrcp.f32 %v161_v3 }
  0x94   : > { %v252_v6 = vpop.eup %251 }
  0x95   : > { %v164_v9 = vmul.f32 %v252_v6, %v149_v4  ;;  %v165_v10 = vmul.f32 %v252_v6, %v150_v5  ;;  %v166_v11 = vmul.f32 %v252_v6, %v151_v7  ;;  %v167_v12 = vmul.f32 %v252_v6, %v152_v8 }
  0x97   : > { %169 = vst.msk [vmem:[%s147_s19] sm:$0xff] %vm168_vm0, %v164_v9  ;;  %170 = vst.msk [vmem:[%s147_s19 + $0x8] sm:$0xff] %vm168_vm0, %v165_v10 }
  0x98   : > { %171 = vst.msk [vmem:[%s147_s19 + $0x10] sm:$0xff] %vm168_vm0, %v166_v11  ;;  %172 = vst.msk [vmem:[%s147_s19 + $0x18] sm:$0xff] %vm168_vm0, %v167_v12 }
  0x99 PF: > { %s14_s11 = sadd.s32 1, %s259_s11  }
  0x9a   : > { %p11_p4 = scmp.ge.s32.totalorder %s14_s11, 4  }
  0x9c   :  { %13 = sbr.rel (!%p11_p4) target bundleno = 3 (0x3), region = 58 }

</bundles_post_ra>
